<compile_context>
chip_gen: v7x
topology: tpu7x:2x2x1
jax: 0.10.0
libtpu: 0.0.40
codegen_flags: <defaults>
</compile_context>

<pallas_src>
import math

import jax
import jax.numpy as jnp
from jax.experimental import pallas as pl
from jax.experimental.pallas import tpu as pltpu


def _round_up(x, m):
    return ((x + m - 1) // m) * m


def _adt_kernel(alpha_ref, x_ref, w_ref, b_ref, o_ref):
    # alpha_ref: (1, 1) f32 scalar in SMEM (already clamped in the wrapper).
    # Compute dtype == parameter dtype (f32 for f32 inputs, native for bf16/f16).
    cdt = w_ref.dtype
    a = alpha_ref[0, 0].astype(cdt)
    xf = x_ref[...].astype(cdt)
    y = w_ref[...] * jnp.tanh(a * xf) + b_ref[...]
    o_ref[...] = y.astype(o_ref.dtype)


def adaptive_dynamic_tanh(x, alpha, weight, bias, *, alpha_min=0.1, alpha_max=2.0,
                          max_row_tile=8192, target_tile_bytes=4 * 1024 * 1024,
                          min_grid_steps=4, vmem_cap_bytes=48 * 1024 * 1024):
    """out = weight * tanh(clamp(alpha, amin, amax) * x) + bias over the last dim."""
    orig_shape = x.shape
    C = orig_shape[-1]
    x2 = x.reshape(-1, C)
    M = x2.shape[0]
    if M == 0 or C == 0:          # degenerate input: nothing to compute
        return x
    itemsize = jnp.dtype(x.dtype).itemsize

    # ---- Lane-dense packing: fold k rows so Cp = k*C is a multiple of 128.
    # Widen toward ~512-1024 lanes for very narrow C (a reshape is free),
    # preferring a k that divides M so no pad / output-slice copy is needed.
    if C % 128 == 0:
        k = 1
    else:
        k = 128 // math.gcd(C, 128)
        if M % k == 0:
            while k * C < 512 and 2 * k * C <= 1024 and M % (2 * k) == 0:
                k *= 2
        else:  # padding needed anyway; just widen toward ~512 lanes
            while k * C < 512 and 2 * k * C <= 1024:
                k *= 2
    Cp = k * C

    # ---- Pad rows only up to a multiple of k (never to a tile multiple).
    Mk = pl.cdiv(M, k)
    Mp = Mk * k
    if Mp != M:
        x2 = jnp.pad(x2, ((0, Mp - M), (0, 0)))
    xp = x2.reshape(Mk, Cp)

    # ---- Row tile: ~target_tile_bytes per tile, rows a multiple of the
    # dtype's sublane quantum; Pallas masks the ragged last block.
    pack = max(1, 4 // itemsize)          # rows packed per sublane (f32:1, bf16:2, i8:4)
    q = 8 * pack                          # sublane quantum: 8 / 16 / 32
    rt = target_tile_bytes // max(1, Cp * itemsize)
    rt = max(q, min(max_row_tile, rt))
    rt = max(q, (rt // q) * q)
    rt = min(rt, _round_up(Mk, q))
    # Keep >= min_grid_steps steps when there is enough work (v7x shards the
    # "parallel" grid over 2 TCs; >=2 steps/TC keeps DMA double-buffered).
    while rt > q and pl.cdiv(Mk, rt) < min_grid_steps:
        rt = max(q, ((rt // 2) // q) * q)
    row_tile = rt
    grid = (pl.cdiv(Mk, row_tile),)

    # ---- Compute dtype & parameters. alpha clamp hoisted; scalar in SMEM.
    compute_dtype = x.dtype if x.dtype in (jnp.bfloat16, jnp.float16) else jnp.float32
    alpha_c = jnp.clip(jnp.asarray(alpha, jnp.float32).reshape(-1)[0],
                       alpha_min, alpha_max).reshape(1, 1)
    w2 = jnp.tile(jnp.asarray(weight, compute_dtype).reshape(-1), k).reshape(1, Cp)
    b2 = jnp.tile(jnp.asarray(bias, compute_dtype).reshape(-1), k).reshape(1, Cp)

    # ---- VMEM budget: double-buffered input + output tiles + params + slack,
    # capped at 48 MiB (safe on v7x's 64 MiB per-TC VMEM).
    tile_bytes = row_tile * Cp * itemsize
    param_bytes = 2 * Cp * jnp.dtype(compute_dtype).itemsize
    vmem_limit = int(min(vmem_cap_bytes,
                         max(16 * 1024 * 1024,
                             4 * tile_bytes + param_bytes + (2 << 20))))

    out = pl.pallas_call(
        _adt_kernel,
        out_shape=jax.ShapeDtypeStruct((Mk, Cp), x.dtype),
        grid=grid,
        in_specs=[
            pl.BlockSpec(memory_space=pltpu.MemorySpace.SMEM),       # alpha (1,1)
            pl.BlockSpec((row_tile, Cp), lambda i: (i, 0)),          # x tile
            pl.BlockSpec((1, Cp), lambda i: (0, 0)),                 # weight (resident)
            pl.BlockSpec((1, Cp), lambda i: (0, 0)),                 # bias (resident)
        ],
        out_specs=pl.BlockSpec((row_tile, Cp), lambda i: (i, 0)),
        compiler_params=pltpu.CompilerParams(
            dimension_semantics=("parallel",),
            vmem_limit_bytes=vmem_limit),
    )(alpha_c, xp, w2, b2)

    out = out.reshape(Mp, C)
    if Mp != M:
        out = out[:M]
    return out.reshape(orig_shape)


if __name__ == "__main__":
    # Module hyper-parameters (match PyTorch __init__ defaults).
    alpha_init_value = 0.5
    alpha_min, alpha_max = 0.1, 2.0

    # Small shapes: batch=2, seq=8, hidden=32  ->  normalized_shape = 32
    B, N, C = 2, 8, 32
    key = jax.random.PRNGKey(0)
    x = jax.random.normal(key, (B, N, C), dtype=jnp.float32)

    # Deterministic parameter init exactly as in the module's __init__.
    alpha = jnp.ones((1,), jnp.float32) * alpha_init_value
    weight = jnp.ones((C,), jnp.float32)
    bias = jnp.zeros((C,), jnp.float32)

    out = adaptive_dynamic_tanh(x, alpha, weight, bias,
                                alpha_min=alpha_min, alpha_max=alpha_max)
    out = jax.block_until_ready(out)

    # Pure-JAX reference check (forward semantics of the module).
    a_clip = jnp.clip(alpha, alpha_min, alpha_max)
    ref = weight * jnp.tanh(a_clip * x) + bias
    assert out.shape == x.shape
    assert jnp.allclose(out, ref, atol=1e-5, rtol=1e-5), "mismatch vs reference"

    # TODO(synk): update_grad_norm / grad_ema EMA logic is a training-time
    # optimizer-step hook on weight.grad, not part of forward; not a kernel.

    print("KERNEL_OK")
</pallas_src>

<mosaic_0001>
module attributes {stable_mosaic.version = 11 : i64} {
  func.func @_adt_kernel(%arg0: i32, %arg1: memref<1x1xf32, #tpu.memory_space<smem>>, %arg2: memref<8x512xf32, #tpu.memory_space<vmem>>, %arg3: memref<1x512xf32, #tpu.memory_space<vmem>>, %arg4: memref<1x512xf32, #tpu.memory_space<vmem>>, %arg5: memref<8x512xf32, #tpu.memory_space<vmem>>) attributes {dimension_semantics = [#tpu.dimension_semantics<parallel>], iteration_bounds = array<i64: 1>, scalar_prefetch = 0 : i64, scratch_operands = 0 : i64, tpu.core_type = #tpu.core_type<tc>, window_params = [{transform_indices = @transform_0, window_bounds = array<i64: 1, 1>}, {transform_indices = @transform_1, window_bounds = array<i64: 8, 512>}, {pipeline_mode = #tpu.pipeline_mode<synchronous>, transform_indices = @transform_2, window_bounds = array<i64: 1, 512>}, {pipeline_mode = #tpu.pipeline_mode<synchronous>, transform_indices = @transform_3, window_bounds = array<i64: 1, 512>}, {transform_indices = @transform_4, window_bounds = array<i64: 8, 512>}]} {
    %c0 = arith.constant 0 : index
    %c0_0 = arith.constant 0 : index
    %0 = memref.load %arg1[%c0, %c0_0] : memref<1x1xf32, #tpu.memory_space<smem>>
    %c0_1 = arith.constant 0 : index
    %c0_2 = arith.constant 0 : index
    %1 = vector.load %arg2[%c0_1, %c0_2] : memref<8x512xf32, #tpu.memory_space<vmem>>, vector<8x512xf32>
    %c0_3 = arith.constant 0 : index
    %c0_4 = arith.constant 0 : index
    %2 = vector.load %arg3[%c0_3, %c0_4] : memref<1x512xf32, #tpu.memory_space<vmem>>, vector<1x512xf32>
    %3 = vector.broadcast %0 : f32 to vector<8x512xf32>
    %4 = arith.mulf %3, %1 : vector<8x512xf32>
    %5 = math.tanh %4 : vector<8x512xf32>
    %6 = vector.broadcast %2 : vector<1x512xf32> to vector<8x512xf32>
    %7 = arith.mulf %6, %5 : vector<8x512xf32>
    %c0_5 = arith.constant 0 : index
    %c0_6 = arith.constant 0 : index
    %8 = vector.load %arg4[%c0_5, %c0_6] : memref<1x512xf32, #tpu.memory_space<vmem>>, vector<1x512xf32>
    %9 = vector.broadcast %8 : vector<1x512xf32> to vector<8x512xf32>
    %10 = arith.addf %7, %9 : vector<8x512xf32>
    %c0_7 = arith.constant 0 : index
    %c0_8 = arith.constant 0 : index
    %11 = vector.load %arg5[%c0_7, %c0_8] : memref<8x512xf32, #tpu.memory_space<vmem>>, vector<8x512xf32>
    tpu.vector_store %arg5[%c0_7, %c0_8], %10 {strides = array<i32>} : memref<8x512xf32, #tpu.memory_space<vmem>>, vector<8x512xf32>,
    return
  }
  func.func @transform_0(%arg0: i32) -> (i32, i32) {
    %c0_i32 = arith.constant 0 : i32
    %c0_i32_0 = arith.constant 0 : i32
    %c0_i32_1 = arith.constant 0 : i32
    return %c0_i32, %c0_i32_0 : i32, i32
  }
  func.func @transform_1(%arg0: i32) -> (i32, i32) {
    %c0_i32 = arith.constant 0 : i32
    %c0_i32_0 = arith.constant 0 : i32
    return %arg0, %c0_i32 : i32, i32
  }
  func.func @transform_2(%arg0: i32) -> (i32, i32) {
    %c0_i32 = arith.constant 0 : i32
    %c0_i32_0 = arith.constant 0 : i32
    %c0_i32_1 = arith.constant 0 : i32
    return %c0_i32, %c0_i32_0 : i32, i32
  }
  func.func @transform_3(%arg0: i32) -> (i32, i32) {
    %c0_i32 = arith.constant 0 : i32
    %c0_i32_0 = arith.constant 0 : i32
    %c0_i32_1 = arith.constant 0 : i32
    return %c0_i32, %c0_i32_0 : i32, i32
  }
  func.func @transform_4(%arg0: i32) -> (i32, i32) {
    %c0_i32 = arith.constant 0 : i32
    %c0_i32_0 = arith.constant 0 : i32
    return %arg0, %c0_i32 : i32, i32
  }
}

</mosaic_0001>

<bundles_post_ra>
// kernel: tpu_custom_call.1
= control target key start
LH: loop header
LB: loop body
LE: loop exit
PB: predicated region body
PF: predicated region fallthrough
CT: control target
= control target key end

     0   :  { %10 = vsyncpa [#allocation4], 0  ;;  %s478_s0 = inlined_call_operand.<no memory space> [shape: f32[1,1], index: 0, kind: input, shape index: {}]   ;;  %s479_s1 = inlined_call_operand.hbm [shape: f32[1,512], index: 1, kind: input, shape index: {}]   ;;  %s480_s2 = inlined_call_operand.vmem [shape: f32[1,512], index: 2, kind: input, shape index: {}]   ;;  %s481_s3 = inlined_call_operand.vmem [shape: f32[1,512], index: 3, kind: input, shape index: {}]   ;;  %s482_s4 = inlined_call_operand.hbm [shape: f32[1,512], index: 4, kind: output, shape index: {}]  }
   0x1   :  { %11 = vsyncpa [#allocation5], 0 }
   0x2   :  { %18 = vsyncadd [#allocation4], 448  ;;  %s369_s15 = smov [#allocation3]   ;;  %s321_s19 = scalar_lea.hbm %s479_s1, 64 }
   0x3   :  { %s19_s16 = sshll.u32 %s369_s15, 4  ;;  %p322_p0 = scmp.ne.s32.totalorder %s479_s1, %s321_s19  ;;  %s20_s16 = int_to_ptr.vmem [resolvable:$true] %s19_s16 }
   0x4   :  { %p325_p1 = scmp.lt.u32.totalorder %s321_s19, %s479_s1 }
   0x6   :  { %p327_p2 = pnand %p325_p1, %p322_p0 }
   0x8   :  { %330 = shalt.err (!%p327_p2)
}
   0x9   :  { %s331_s24 = scalar_lea.vmem %s20_s16, 64  ;;  %s335_s25 = scalar_lea.vmem %s20_s16, 512 }
   0xa   :  { %p332_p3 = scmp.ne.s32.totalorder %s20_s16, %s331_s24  ;;  %p336_p4 = scmp.lt.s32.totalorder %s20_s16, %s20_s16 }
   0xb   :  { %p337_p5 = scmp.lt.s32.totalorder %s335_s25, %s331_s24 }
   0xd   :  { %p338_p6 = por %p337_p5, %p336_p4 }
   0xf   :  { %p339_p7 = pnand %p338_p6, %p332_p3 }
  0x11   :  { %342 = shalt.err (!%p339_p7)
}
  0x12   :  { %s370_s26 = smov 64   ;;  %s371_s27 = smov 4  }
  0x13   :  { %25 = dma.hbm_to_vmem [thread:$0]  %s479_s1, 64, %s20_s16, [#allocation4], %s370_s26, %s370_s26, %s371_s27  }
  0x14   :  { %365 = dma.done.wait [#allocation4], 512  }
  0x15   :  { %366 = vsyncadd [#allocation4], 4294966784  ;;  %v43_v0 = vstv %s478_s0  ;;  %v34_v1 = vld [vmem:[#allocation3] sm:$0xf]  ;;  %v35_v2 = vld [vmem:[#allocation3 + $0x4] sm:$0xf]  ;;  %v61_v16 = vlaneseq }
  0x16   :  { %v36_v3 = vld [vmem:[#allocation3 + $0x8] sm:$0xf]  ;;  %v37_v4 = vld [vmem:[#allocation3 + $0xc] sm:$0xf]  ;;  %v38_v5 = vld [vmem:[#allocation3 + $0x10] sm:$0xf]  ;;  %v44_v7 = vmul.f32 %v43_v0, %v34_v1  ;;  %v45_v8 = vmul.f32 %v43_v0, %v35_v2 }
  0x17   :  { %v39_v6 = vld [vmem:[#allocation3 + $0x14] sm:$0xf]  ;;  %v46_v9 = vmul.f32 %v43_v0, %v36_v3  ;;  %v40_v10 = vld [vmem:[#allocation3 + $0x18] sm:$0xf]  ;;  %v47_v11 = vmul.f32 %v43_v0, %v37_v4  ;;  %v41_v12 = vld [vmem:[#allocation3 + $0x1c] sm:$0xf]  ;;  %v48_v13 = vmul.f32 %v43_v0, %v38_v5 }
  0x18   :  { %305 = vtanh.f32 %v44_v7  ;;  %v49_v14 = vmul.f32 %v43_v0, %v39_v6  ;;  %v50_v15 = vmul.f32 %v43_v0, %v40_v10  ;;  %v372_v17 = vmov 1966171168   ;;  %v42_v42 = vld [vmem:[%s480_s2] sm:$0xf] }
  0x19   :  { %307 = vtanh.f32 %v45_v8  ;;  %v94_v18 = vunpack.c.l.s4 %v372_v17  ;;  %v51_v19 = vmul.f32 %v43_v0, %v41_v12  ;;  %v62_v20 = vshrl.u32 %v61_v16, 7  ;;  %v165_v50 = vld [vmem:[%s481_s3] sm:$0xf] }
  0x1a   :  { %309 = vtanh.f32 %v46_v9  ;;  %vm439_vm0 = vcmp.lt.s32.totalorder %v61_v16, 512 }
  0x1b   :  { %311 = vtanh.f32 %v47_v11  ;;  %v95_v21 = vunpack.c.0.s8 %v94_v18  ;;  %v63_v40 = vsub.s32 0, %v62_v20  ;;  %v67_v41 = vsub.s32 1, %v62_v20 }
  0x1c   :  { %313 = vtanh.f32 %v48_v13  ;;  %v71_v43 = vsub.s32 2, %v62_v20  ;;  %v75_v44 = vsub.s32 3, %v62_v20 }
  0x1d   :  { %315 = vtanh.f32 %v49_v14  ;;  %v418_v23 = vsub.s32 %v95_v21, %v62_v20  ;;  %v64_v51 = vrot.slane %v42_v42, %v63_v40  ;;  %v68_v52 = vrot.slane %v42_v42, %v67_v41 }
  0x1e   :  { %317 = vtanh.f32 %v50_v15  ;;  %v72_v53 = vrot.slane %v42_v42, %v71_v43  ;;  %v76_v54 = vrot.slane %v42_v42, %v75_v44  ;;  %v170_v57 = vrot.slane %v165_v50, %v63_v40 }
  0x1f   :  { %319 = vtanh.f32 %v51_v19  ;;  %v174_v58 = vrot.slane %v165_v50, %v67_v41  ;;  %v178_v59 = vrot.slane %v165_v50, %v71_v43  ;;  %v182_v60 = vrot.slane %v165_v50, %v75_v44 }
  0x22   :  { %v306_v22 = vpop.eup %305 }
  0x23   :  { %v308_v24 = vpop.eup %307 }
  0x24   :  { %v310_v25 = vpop.eup %309  ;;  %v89_v26 = vcombine.low %v306_v22, %v308_v24 }
  0x25   :  { %v312_v27 = vpop.eup %311 }
  0x26   :  { %v314_v28 = vpop.eup %313  ;;  %v90_v29 = vcombine.low %v310_v25, %v312_v27  ;;  %v99_v30 = vrot.slane %v89_v26, %v418_v23 }
  0x27   :  { %v316_v31 = vpop.eup %315 }
  0x28   :  { %v318_v32 = vpop.eup %317  ;;  %v91_v33 = vcombine.low %v314_v28, %v316_v31  ;;  %v106_v34 = vrot.slane %v90_v29, %v418_v23 }
  0x29   :  { %v320_v35 = vpop.eup %319 }
  0x2a   :  { %v92_v36 = vcombine.low %v318_v32, %v320_v35  ;;  %v113_v37 = vrot.slane %v91_v33, %v418_v23  ;;  %v121_v38 = vcombine.low %v99_v30, %v106_v34  ;;  %v122_v39 = vcombine.high %v99_v30, %v106_v34 }
  0x2c   :  { %v120_v45 = vrot.slane %v92_v36, %v418_v23  ;;  %v131_v48 = vrot.slane %v121_v38, %v418_v23  ;;  %v138_v49 = vrot.slane %v122_v39, %v418_v23 }
  0x2e   :  { %v123_v46 = vcombine.low %v113_v37, %v120_v45  ;;  %v124_v47 = vcombine.high %v113_v37, %v120_v45 }
  0x30   :  { %v145_v55 = vrot.slane %v123_v46, %v418_v23  ;;  %v152_v56 = vrot.slane %v124_v47, %v418_v23 }
  0x32   :  { %v153_v61 = vcombine.low %v131_v48, %v145_v55  ;;  %v154_v62 = vcombine.high %v131_v48, %v145_v55  ;;  %v155_v63 = vcombine.low %v138_v49, %v152_v56  ;;  %v156_v0 = vcombine.high %v138_v49, %v152_v56 }
  0x34   :  { %v161_v1 = vmul.f32 %v153_v61, %v64_v51  ;;  %v162_v2 = vmul.f32 %v155_v63, %v68_v52  ;;  %v163_v3 = vmul.f32 %v154_v62, %v72_v53  ;;  %v164_v4 = vmul.f32 %v156_v0, %v76_v54 }
  0x36   :  { %v187_v5 = vadd.f32 %v170_v57, %v161_v1  ;;  %v188_v6 = vadd.f32 %v174_v58, %v162_v2  ;;  %v189_v7 = vadd.f32 %v178_v59, %v163_v3  ;;  %v190_v8 = vadd.f32 %v182_v60, %v164_v4 }
  0x38   :  { %v195_v9 = vcombine.low %v187_v5, %v188_v6  ;;  %v197_v10 = vcombine.low %v189_v7, %v190_v8  ;;  %v196_v11 = vcombine.high %v187_v5, %v188_v6  ;;  %v198_v12 = vcombine.high %v189_v7, %v190_v8 }
  0x3a   :  { %v205_v13 = vrot.slane %v195_v9, %v418_v23  ;;  %v219_v14 = vrot.slane %v197_v10, %v418_v23  ;;  %v212_v15 = vrot.slane %v196_v11, %v418_v23  ;;  %v226_v17 = vrot.slane %v198_v12, %v418_v23 }
  0x3c   :  { %v227_v18 = vcombine.low %v205_v13, %v219_v14  ;;  %v228_v19 = vcombine.high %v205_v13, %v219_v14  ;;  %v229_v20 = vcombine.low %v212_v15, %v226_v17  ;;  %v230_v21 = vcombine.high %v212_v15, %v226_v17 }
  0x3e   :  { %v237_v24 = vrot.slane %v227_v18, %v418_v23  ;;  %v251_v25 = vrot.slane %v228_v19, %v418_v23  ;;  %v244_v26 = vrot.slane %v229_v20, %v418_v23  ;;  %v258_v27 = vrot.slane %v230_v21, %v418_v23 }
  0x40   :  { %275 = vst.msk [vmem:[#allocation6] sm:$0xf] %vm439_vm0, %v237_v24  ;;  %276 = vst.msk [vmem:[#allocation6 + $0x4] sm:$0xf] %vm439_vm0, %v251_v25  ;;  %v259_v28 = vcombine.high %v237_v24, %v237_v24  ;;  %v261_v29 = vcombine.high %v251_v25, %v251_v25  ;;  %v260_v16 = vcombine.high %v244_v26, %v244_v26 }
  0x41   :  { %279 = vst.msk [vmem:[#allocation6 + $0x10] sm:$0xf] %vm439_vm0, %v244_v26  ;;  %280 = vst.msk [vmem:[#allocation6 + $0x14] sm:$0xf] %vm439_vm0, %v258_v27  ;;  %v262_v30 = vcombine.high %v258_v27, %v258_v27 }
  0x42   :  { %277 = vst.msk [vmem:[#allocation6 + $0x8] sm:$0xf] %vm439_vm0, %v259_v28  ;;  %278 = vst.msk [vmem:[#allocation6 + $0xc] sm:$0xf] %vm439_vm0, %v261_v29 }
  0x43   :  { %281 = vst.msk [vmem:[#allocation6 + $0x18] sm:$0xf] %vm439_vm0, %v260_v16  ;;  %282 = vst.msk [vmem:[#allocation6 + $0x1c] sm:$0xf] %vm439_vm0, %v262_v30 }
  0x44   :  { %287 = vsyncadd [#allocation5], 448  ;;  %s373_s2 = smov [#allocation6]  }
  0x45   :  { %s288_s3 = sshll.u32 %s373_s2, 4  ;;  %s289_s3 = int_to_ptr.vmem [resolvable:$true] %s288_s3 }
  0x46   :  { %s343_s8 = scalar_lea.vmem %s289_s3, 64  ;;  %s347_s9 = scalar_lea.vmem %s289_s3, 512 }
  0x47   :  { %p344_p8 = scmp.ne.s32.totalorder %s289_s3, %s343_s8  ;;  %p348_p9 = scmp.lt.s32.totalorder %s289_s3, %s289_s3 }
  0x48   :  { %p349_p10 = scmp.lt.s32.totalorder %s347_s9, %s343_s8 }
  0x4a   :  { %p350_p11 = por %p349_p10, %p348_p9 }
  0x4c   :  { %p351_p12 = pnand %p350_p11, %p344_p8 }
  0x4e   :  { %354 = shalt.err (!%p351_p12)
}
  0x4f   :  { %s355_s12 = scalar_lea.hbm %s482_s4, 64 }
  0x50   :  { %p356_p13 = scmp.ne.s32.totalorder %s482_s4, %s355_s12  ;;  %p359_p0 = scmp.lt.u32.totalorder %s355_s12, %s482_s4 }
  0x52   :  { %p361_p1 = pnand %p359_p0, %p356_p13 }
  0x54   :  { %364 = shalt.err (!%p361_p1)
}
  0x55   :  { %294 = dma.vmem_to_hbm [thread:$0]  %s289_s3, 64, %s482_s4, [#allocation5], %s370_s26, %s370_s26, %s371_s27  }
  0x56   :  { %367 = dma.done.wait [#allocation5], 512  }
  0x57   :  { %368 = vsyncadd [#allocation5], 4294966784 }
  0x58   :  { %298 = vsyncpa [#allocation4], 1 }
  0x59   :  { %299 = vsyncpa [#allocation5], 1 }

</bundles_post_ra>
